<compile_context>
chip_gen: v7x
topology: tpu7x:2x2x1
jax: 0.10.0
libtpu: 0.0.40
codegen_flags: <defaults>
</compile_context>

<pallas_src>
import jax
import jax.numpy as jnp
from jax.experimental import pallas as pl
from jax.experimental.pallas import tpu as pltpu

ESP = 1e-8
LANES = 128      # vreg lane width: minor dim stays fully dense.
SUBLANES = 8


def _contrib(p_ref, g_ref):
    """sqrt(p*g+eps) + sqrt((1-p)*(1-g)+eps) for the current tile, in f32."""
    p = p_ref[...].astype(jnp.float32)
    g = g_ref[...].astype(jnp.float32)
    return jnp.sqrt(p * g + ESP) + jnp.sqrt((1.0 - p) * (1.0 - g) + ESP)


def _make_single_block_kernel(n_valid, rows):
    """Whole problem in one (rows, 128) full-extent block -> (1, 1) sum."""
    rows_full = n_valid // LANES
    rem = n_valid % LANES
    need_mask = rows * LANES != n_valid   # static

    def kernel(p_ref, g_ref, o_ref):
        s = _contrib(p_ref, g_ref)
        if need_mask:
            row = jax.lax.broadcasted_iota(jnp.int32, s.shape, 0)
            lane = jax.lax.broadcasted_iota(jnp.int32, s.shape, 1)
            valid = (row < rows_full) | ((row == rows_full) & (lane < rem))
            s = jnp.where(valid, s, 0.0)
        o_ref[...] = jnp.sum(s, keepdims=True)

    return kernel


def _make_tiled_kernel(n_valid, rows, block_rows):
    """One (block_rows, 128) tile per grid step -> per-step (8, 128) partials."""
    rows_full = n_valid // LANES
    rem = n_valid % LANES
    # Mask only if the last block hangs past the valid data (explicit lane
    # padding and/or Pallas' undefined partial-block region).  Static flag.
    need_mask = (rem != 0) or (rows % block_rows != 0)
    sub = block_rows // SUBLANES

    def kernel(p_ref, g_ref, o_ref):
        s = _contrib(p_ref, g_ref)                       # (block_rows, 128) f32
        if need_mask:
            row = (pl.program_id(0) * block_rows
                   + jax.lax.broadcasted_iota(jnp.int32, s.shape, 0))
            if rem:
                lane = jax.lax.broadcasted_iota(jnp.int32, s.shape, 1)
                valid = (row < rows_full) | ((row == rows_full) & (lane < rem))
            else:
                valid = row < rows_full
            s = jnp.where(valid, s, 0.0)
        # Per-block partial sum: (block_rows//8, 8, 128) summed over axis 0 is
        # pure VPU vreg accumulation -- no cross-lane XLU reduce in the loop.
        o_ref[...] = jnp.sum(s.reshape(sub, SUBLANES, LANES), axis=0)

    return kernel


def fidelity_loss(p, g, *, block_rows=8192):
    """Pallas implementation of Fidelity_Loss.forward(p, g)."""
    assert p.shape == g.shape, (p.shape, g.shape)
    n = int(p.size)
    assert n > 0

    pf = jnp.ravel(p)          # free (contiguous) reshape
    gf = jnp.ravel(g)
    itemsize = jnp.dtype(p.dtype).itemsize

    # Lane-dense layout: (rows, 128).  When n is a multiple of 128 (common
    # case) this is a pure metadata reshape -- zero extra HBM traffic.
    rows = -(-n // LANES)
    n_pad = rows * LANES - n
    if n_pad:
        # TODO(synk): a sub-128 tail forces one extra pass over the inputs; the
        # padded elements are masked out inside the kernel (exact, no epilogue).
        pf = jnp.pad(pf, (0, n_pad))
        gf = jnp.pad(gf, (0, n_pad))
    p2 = pf.reshape(rows, LANES)
    g2 = gf.reshape(rows, LANES)

    # Tile sizing: multiple of 8 sublanes (16 for sub-32-bit packing); bf16
    # gets double the rows for the same VMEM footprint (half the HBM traffic).
    row_quant = 16 if itemsize < 4 else SUBLANES
    if itemsize < 4:
        block_rows *= 2
    block_rows = max(row_quant, (block_rows // row_quant) * row_quant)

    cost = pl.CostEstimate(flops=7 * n, transcendentals=2 * n,
                           bytes_accessed=2 * n * itemsize + 4)
    compiler_params = pltpu.CompilerParams(
        dimension_semantics=("parallel",),
        vmem_limit_bytes=32 * 1024 * 1024,
    )

    if rows <= block_rows:
        # Single full-extent block: no pipelining, no partials needed.
        total = pl.pallas_call(
            _make_single_block_kernel(n, rows),
            out_shape=jax.ShapeDtypeStruct((1, 1), jnp.float32),
            grid=(1,),
            in_specs=[pl.BlockSpec((rows, LANES), lambda i: (0, 0))] * 2,
            out_specs=pl.BlockSpec((1, 1), lambda i: (0, 0)),
            compiler_params=compiler_params,
            cost_estimate=cost,
        )(p2, g2)[0, 0]
    else:
        num_blocks = -(-rows // block_rows)
        partials = pl.pallas_call(
            _make_tiled_kernel(n, rows, block_rows),
            out_shape=jax.ShapeDtypeStruct((num_blocks * SUBLANES, LANES),
                                           jnp.float32),
            grid=(num_blocks,),
            in_specs=[pl.BlockSpec((block_rows, LANES), lambda i: (i, 0))] * 2,
            out_specs=pl.BlockSpec((SUBLANES, LANES), lambda i: (i, 0)),
            compiler_params=compiler_params,
            cost_estimate=cost,
        )(p2, g2)
        total = jnp.sum(partials)

    # mean(1 - s_i) == 1 - sum(s_i) / n
    return jnp.float32(1.0) - total / jnp.float32(n)


def _reference(p, g):
    # Pure-JAX reference mirroring the PyTorch module exactly.
    pf = jnp.ravel(p).astype(jnp.float32)[:, None]
    gf = jnp.ravel(g).astype(jnp.float32)[:, None]
    loss = 1.0 - (jnp.sqrt(pf * gf + ESP) + jnp.sqrt((1.0 - pf) * (1.0 - gf) + ESP))
    return jnp.mean(loss)


if __name__ == "__main__":
    key = jax.random.PRNGKey(0)
    keys = jax.random.split(key, 6)

    # Case 1: small lane-aligned input (single-block path, zero-copy reshape).
    p = jax.nn.sigmoid(jax.random.normal(keys[0], (2, 4, 16, 16), jnp.float32))
    g = jax.nn.sigmoid(jax.random.normal(keys[1], (2, 4, 16, 16), jnp.float32))
    out = jax.block_until_ready(fidelity_loss(p, g))
    ref = _reference(p, g)
    assert jnp.allclose(out, ref, atol=1e-6, rtol=1e-6), (out, ref)

    # Case 2: multi-block "parallel partials" path, lane-aligned, mask-free
    # (tiny block_rows only to exercise the tiled code path at small sizes).
    p2 = jax.nn.sigmoid(jax.random.normal(keys[2], (64, 128), jnp.float32))
    g2 = jax.nn.sigmoid(jax.random.normal(keys[3], (64, 128), jnp.float32))
    out2 = jax.block_until_ready(fidelity_loss(p2, g2, block_rows=16))
    ref2 = _reference(p2, g2)
    assert jnp.allclose(out2, ref2, atol=1e-6, rtol=1e-6), (out2, ref2)

    # Case 3: non-128-aligned element count + partial last grid block:
    # exercises the in-kernel iota masking on both the row and lane axes.
    p3 = jax.nn.sigmoid(jax.random.normal(keys[4], (40, 37), jnp.float32))
    g3 = jax.nn.sigmoid(jax.random.normal(keys[5], (40, 37), jnp.float32))
    out3 = jax.block_until_ready(fidelity_loss(p3, g3, block_rows=8))
    ref3 = _reference(p3, g3)
    assert jnp.allclose(out3, ref3, atol=1e-5, rtol=1e-5), (out3, ref3)

    print("KERNEL_OK")
</pallas_src>

<mosaic_0001>
module attributes {stable_mosaic.version = 11 : i64} {
  func.func @kernel(%arg0: i32, %arg1: memref<16x128xf32, #tpu.memory_space<vmem>>, %arg2: memref<16x128xf32, #tpu.memory_space<vmem>>, %arg3: memref<1x1xf32, #tpu.memory_space<vmem>>) attributes {dimension_semantics = [#tpu.dimension_semantics<parallel>], iteration_bounds = array<i64: 1>, scalar_prefetch = 0 : i64, scratch_operands = 0 : i64, tpu.core_type = #tpu.core_type<tc>, window_params = [{pipeline_mode = #tpu.pipeline_mode<synchronous>, transform_indices = @transform_0, window_bounds = array<i64: 16, 128>}, {pipeline_mode = #tpu.pipeline_mode<synchronous>, transform_indices = @transform_1, window_bounds = array<i64: 16, 128>}, {pipeline_mode = #tpu.pipeline_mode<synchronous>, transform_indices = @transform_2, window_bounds = array<i64: 1, 1>}]} {
    %c0 = arith.constant 0 : index
    %c0_0 = arith.constant 0 : index
    %0 = vector.load %arg1[%c0, %c0_0] : memref<16x128xf32, #tpu.memory_space<vmem>>, vector<16x128xf32>
    %c0_1 = arith.constant 0 : index
    %c0_2 = arith.constant 0 : index
    %1 = vector.load %arg2[%c0_1, %c0_2] : memref<16x128xf32, #tpu.memory_space<vmem>>, vector<16x128xf32>
    %2 = arith.mulf %0, %1 : vector<16x128xf32>
    %cst = arith.constant 9.99999993E-9 : f32
    %3 = vector.broadcast %cst : f32 to vector<16x128xf32>
    %4 = arith.addf %2, %3 : vector<16x128xf32>
    %5 = math.sqrt %4 : vector<16x128xf32>
    %cst_3 = arith.constant 1.000000e+00 : f32
    %6 = vector.broadcast %cst_3 : f32 to vector<16x128xf32>
    %7 = arith.subf %6, %0 : vector<16x128xf32>
    %cst_4 = arith.constant 1.000000e+00 : f32
    %8 = vector.broadcast %cst_4 : f32 to vector<16x128xf32>
    %9 = arith.subf %8, %1 : vector<16x128xf32>
    %10 = arith.mulf %7, %9 : vector<16x128xf32>
    %cst_5 = arith.constant 9.99999993E-9 : f32
    %11 = vector.broadcast %cst_5 : f32 to vector<16x128xf32>
    %12 = arith.addf %10, %11 : vector<16x128xf32>
    %13 = math.sqrt %12 : vector<16x128xf32>
    %14 = arith.addf %5, %13 : vector<16x128xf32>
    %15 = vector.shape_cast %14 : vector<16x128xf32> to vector<1x16x128xf32>
    %cst_6 = arith.constant dense<0.000000e+00> : vector<1xf32>
    %16 = vector.multi_reduction <add>, %15, %cst_6 [1, 2] : vector<1x16x128xf32> to vector<1xf32>
    %17 = vector.shape_cast %16 : vector<1xf32> to vector<1x1x1xf32>
    %18 = vector.extract %17[0, 0, 0] : f32 from vector<1x1x1xf32>
    %19 = vector.broadcast %18 : f32 to vector<1x1xf32>
    %c0_7 = arith.constant 0 : index
    %c0_8 = arith.constant 0 : index
    %20 = vector.load %arg3[%c0_7, %c0_8] : memref<1x1xf32, #tpu.memory_space<vmem>>, vector<1x1xf32>
    tpu.vector_store %arg3[%c0_7, %c0_8], %19 {strides = array<i32>} : memref<1x1xf32, #tpu.memory_space<vmem>>, vector<1x1xf32>,
    return
  }
  func.func @transform_0(%arg0: i32) -> (i32, i32) {
    %c0_i32 = arith.constant 0 : i32
    %c0_i32_0 = arith.constant 0 : i32
    %c0_i32_1 = arith.constant 0 : i32
    return %c0_i32, %c0_i32_0 : i32, i32
  }
  func.func @transform_1(%arg0: i32) -> (i32, i32) {
    %c0_i32 = arith.constant 0 : i32
    %c0_i32_0 = arith.constant 0 : i32
    %c0_i32_1 = arith.constant 0 : i32
    return %c0_i32, %c0_i32_0 : i32, i32
  }
  func.func @transform_2(%arg0: i32) -> (i32, i32) {
    %c0_i32 = arith.constant 0 : i32
    %c0_i32_0 = arith.constant 0 : i32
    %c0_i32_1 = arith.constant 0 : i32
    return %c0_i32, %c0_i32_0 : i32, i32
  }
}

</mosaic_0001>

<bundles_post_ra>
// kernel: tpu_custom_call.1
= control target key start
LH: loop header
LB: loop body
LE: loop exit
PB: predicated region body
PF: predicated region fallthrough
CT: control target
= control target key end

     0   :  { %7 = vsyncpa [#allocation3], 0  ;;  %s258_s0 = inlined_call_operand.hbm [shape: f32[16,128], index: 0, kind: input, shape index: {}]   ;;  %s259_s1 = inlined_call_operand.hbm [shape: f32[16,128], index: 1, kind: input, shape index: {}]   ;;  %s260_s2 = inlined_call_operand.hbm [shape: f32[1,1], index: 2, kind: output, shape index: {}]  }
   0x1   :  { %8 = vsyncpa [#allocation6], 0 }
   0x2   :  { %9 = vsyncpa [#allocation4], 0  ;;  %s202_s9 = smov [#allocation2]   ;;  %s130_s13 = scalar_lea.hbm %s258_s0, 256 }
   0x3   :  { %s15_s10 = sshll.u32 %s202_s9, 4  ;;  %p131_p0 = scmp.ne.s32.totalorder %s258_s0, %s130_s13  ;;  %s16_s10 = int_to_ptr.vmem [resolvable:$true] %s15_s10 }
   0x4   :  { %p134_p1 = scmp.lt.u32.totalorder %s130_s13, %s258_s0 }
   0x6   :  { %p136_p2 = pnand %p134_p1, %p131_p0 }
   0x8   :  { %139 = shalt.err (!%p136_p2)
}
   0x9   :  { %s140_s18 = scalar_lea.vmem %s16_s10, 256  ;;  %p145_p4 = scmp.lt.s32.totalorder %s16_s10, %s16_s10 }
   0xa   :  { %p141_p3 = scmp.ne.s32.totalorder %s16_s10, %s140_s18  ;;  %p146_p5 = scmp.lt.s32.totalorder %s140_s18, %s140_s18 }
   0xc   :  { %p147_p6 = por %p146_p5, %p145_p4 }
   0xe   :  { %p148_p7 = pnand %p147_p6, %p141_p3 }
  0x10   :  { %151 = shalt.err (!%p148_p7)
}
  0x11   :  { %s203_s19 = smov 128   ;;  %s204_s20 = smov 8  }
  0x12   :  { %21 = dma.hbm_to_vmem [thread:$0]  %s258_s0, 256, %s16_s10, [#allocation3], %s203_s19, %s203_s19, %s204_s20  }
  0x13   :  { %s205_s23 = smov [#allocation5]   ;;  %s152_s27 = scalar_lea.hbm %s259_s1, 256 }
  0x14   :  { %s27_s24 = sshll.u32 %s205_s23, 4  ;;  %p153_p8 = scmp.ne.s32.totalorder %s259_s1, %s152_s27  ;;  %s28_s24 = int_to_ptr.vmem [resolvable:$true] %s27_s24 }
  0x15   :  { %p156_p9 = scmp.lt.u32.totalorder %s152_s27, %s259_s1 }
  0x17   :  { %p158_p10 = pnand %p156_p9, %p153_p8 }
  0x19   :  { %161 = shalt.err (!%p158_p10)
}
  0x1a   :  { %s162_s4 = scalar_lea.vmem %s28_s24, 256  ;;  %p167_p12 = scmp.lt.s32.totalorder %s28_s24, %s28_s24 }
  0x1b   :  { %p163_p11 = scmp.ne.s32.totalorder %s28_s24, %s162_s4  ;;  %p168_p13 = scmp.lt.s32.totalorder %s162_s4, %s162_s4 }
  0x1d   :  { %p169_p0 = por %p168_p13, %p167_p12 }
  0x1f   :  { %p170_p1 = pnand %p169_p0, %p163_p11 }
  0x21   :  { %173 = shalt.err (!%p170_p1)
}
  0x22   :  { %33 = dma.hbm_to_vmem [thread:$0]  %s259_s1, 256, %s28_s24, [#allocation6], %s203_s19, %s203_s19, %s204_s20  }
  0x23   :  { %196 = dma.done.wait [#allocation3], 256  }
  0x24   :  { %197 = vsyncadd [#allocation3], 4294967040 }
  0x25   :  { %198 = dma.done.wait [#allocation6], 256  }
  0x26   :  { %199 = vsyncadd [#allocation6], 4294967040  ;;  %v40_v0 = vld [vmem:[#allocation2] sm:$0xff]  ;;  %v41_v1 = vld [vmem:[#allocation2 + $0x8] sm:$0xff]  ;;  %s206_s1 = smov [#allocation7]   ;;  %vm97_vm8 = vcmask 0  }
  0x27   :  { %v42_v2 = vld [vmem:[#allocation5] sm:$0xff]  ;;  %v43_v3 = vld [vmem:[#allocation5 + $0x8] sm:$0xff]  ;;  %v62_v5 = vsub.f32 1.0, %v40_v0  ;;  %v63_v6 = vsub.f32 1.0, %v41_v1  ;;  %s105_s6 = sshll.u32 %s206_s1, 4  ;;  %s106_s6 = int_to_ptr.vmem [resolvable:$true] %s105_s6 }
  0x28   :  { %v44_v4 = vmul.f32 %v42_v2, %v40_v0  ;;  %v64_v7 = vsub.f32 1.0, %v42_v2  ;;  %v45_v8 = vmul.f32 %v43_v3, %v41_v1  ;;  %v65_v9 = vsub.f32 1.0, %v43_v3  ;;  %s174_s8 = scalar_lea.vmem %s106_s6, 16  ;;  %s178_s9 = scalar_lea.vmem %s106_s6, 32 }
  0x29   :  { %p175_p2 = scmp.ne.s32.totalorder %s106_s6, %s174_s8  ;;  %p179_p3 = scmp.lt.s32.totalorder %s106_s6, %s106_s6 }
  0x2a   :  { %v46_v10 = vadd.f32 1e-08, %v44_v4  ;;  %v66_v11 = vmul.f32 %v64_v7, %v62_v5  ;;  %v47_v12 = vadd.f32 1e-08, %v45_v8  ;;  %v67_v13 = vmul.f32 %v65_v9, %v63_v6  ;;  %p180_p4 = scmp.lt.s32.totalorder %s178_s9, %s174_s8 }
  0x2c   :  { %122 = vrsqrt.f32 %v46_v10  ;;  %v68_v14 = vadd.f32 1e-08, %v66_v11  ;;  %v69_v15 = vadd.f32 1e-08, %v67_v13  ;;  %vm50_vm0 = vcmp.eq.f32.partialorder %v46_v10, inf  ;;  %p181_p5 = por %p180_p4, %p179_p3 }
  0x2d   :  { %124 = vrsqrt.f32 %v47_v12  ;;  %vm57_vm1 = vcmp.eq.f32.partialorder %v47_v12, inf  ;;  %v53_v19 = vand.u32 2147483648, %v46_v10  ;;  %vm52_vm2 = vcmp.eq.f32.partialorder %v46_v10, 0.0 }
  0x2e   :  { %126 = vrsqrt.f32 %v68_v14  ;;  %v60_v22 = vand.u32 2147483648, %v47_v12  ;;  %vm59_vm3 = vcmp.eq.f32.partialorder %v47_v12, 0.0  ;;  %vm72_vm4 = vcmp.eq.f32.partialorder %v68_v14, inf  ;;  %p182_p6 = pnand %p181_p5, %p175_p2 }
  0x2f   :  { %128 = vrsqrt.f32 %v69_v15  ;;  %v75_v25 = vand.u32 2147483648, %v68_v14  ;;  %vm74_vm5 = vcmp.eq.f32.partialorder %v68_v14, 0.0  ;;  %vm79_vm6 = vcmp.eq.f32.partialorder %v69_v15, inf }
  0x30   :  { %v82_v28 = vand.u32 2147483648, %v69_v15  ;;  %vm81_vm7 = vcmp.eq.f32.partialorder %v69_v15, 0.0 }
  0x36   :  { %v123_v16 = vpop.eup %122 }
  0x37   :  { %v125_v17 = vpop.eup %124  ;;  %v49_v18 = vmul.f32 %v123_v16, %v46_v10 }
  0x38   :  { %v56_v20 = vmul.f32 %v125_v17, %v47_v12  ;;  %v127_v23 = vpop.eup %126 }
  0x39   :  { %v51_v21 = vsel %vm50_vm0, %v46_v10, %v49_v18  ;;  %v129_v26 = vpop.eup %128  ;;  %v71_v27 = vmul.f32 %v127_v23, %v68_v14 }
  0x3a   :  { %v58_v24 = vsel %vm57_vm1, %v47_v12, %v56_v20  ;;  %v54_v29 = vsel %vm52_vm2, %v53_v19, %v51_v21  ;;  %v78_v30 = vmul.f32 %v129_v26, %v69_v15 }
  0x3b   :  { %v61_v31 = vsel %vm59_vm3, %v60_v22, %v58_v24  ;;  %v73_v32 = vsel %vm72_vm4, %v68_v14, %v71_v27 }
  0x3c   :  { %v76_v33 = vsel %vm74_vm5, %v75_v25, %v73_v32  ;;  %v80_v34 = vsel %vm79_vm6, %v69_v15, %v78_v30 }
  0x3d   :  { %v83_v35 = vsel %vm81_vm7, %v82_v28, %v80_v34  ;;  %v84_v36 = vadd.f32 %v76_v33, %v54_v29 }
  0x3e   :  { %v85_v37 = vadd.f32 %v83_v35, %v61_v31 }
  0x40   :  { %v86_v38 = vadd.f32 %v85_v37, %v84_v36 }
  0x42   :  { %87 = vadd.xlane.f32.xlu0 %v86_v38 }
  0xcf   :  { %v88_v39 = vpop.xlane.xlu0 %87 }
  0xd0   :  { %v89_v40 = vrot.slane %v88_v39, 4 }
  0xd2   :  { %v90_v41 = vadd.f32 %v89_v40, %v88_v39 }
  0xd4   :  { %v91_v42 = vrot.slane %v90_v41, 2 }
  0xd6   :  { %v92_v43 = vadd.f32 %v91_v42, %v90_v41 }
  0xd8   :  { %v93_v44 = vrot.slane %v92_v43, 1 }
  0xda   :  { %v94_v45 = vadd.f32 %v93_v44, %v92_v43 }
  0xdc   :  { %115 = vpush %v94_v45 }
 0x10d   :  { %s116_s7 = spop %115 }
 0x10e   :  { %v96_v46 = vstv %s116_s7 }
 0x10f   :  { %98 = vst.msk [vmem:[#allocation7] sm:$0x1] %vm97_vm8, %v96_v46 }
 0x110   :  { %185 = shalt.err (!%p182_p6)
}
 0x111   :  { %s186_s12 = scalar_lea.hbm %s260_s2, 16 }
 0x112   :  { %p187_p7 = scmp.ne.s32.totalorder %s260_s2, %s186_s12  ;;  %p190_p8 = scmp.lt.u32.totalorder %s186_s12, %s260_s2 }
 0x114   :  { %p192_p9 = pnand %p190_p8, %p187_p7 }
 0x116   :  { %195 = shalt.err (!%p192_p9)
}
 0x117   :  { %108 = dma.vmem_to_hbm [thread:$0]  %s106_s6, 16, %s260_s2, [#allocation4]  }
 0x118   :  { %200 = dma.done.wait [#allocation4], 16  }
 0x119   :  { %201 = vsyncadd [#allocation4], 4294967280 }
 0x11a   :  { %112 = vsyncpa [#allocation3], 1 }
 0x11b   :  { %113 = vsyncpa [#allocation6], 1 }
 0x11c   :  { %114 = vsyncpa [#allocation4], 1 }

</bundles_post_ra>
